<compile_context>
chip_gen: v7x
topology: tpu7x:2x2x1
jax: 0.10.0
libtpu: 0.0.40
codegen_flags: <defaults>
</compile_context>

<pallas_src>
import functools

import jax
import jax.numpy as jnp
from jax.experimental import pallas as pl
from jax.experimental.pallas import tpu as pltpu

HIDDEN = 256      # fc1/fc2 width (fixed by the module)
OUT = 6           # fc3 output width
OUT_PAD = 128     # lane-dense padded output width
MAX_TILE_B = 1024  # rows per grid step (multiple of 8)


def _round_up(n, m):
    return ((n + m - 1) // m) * m


# --------------------------- kernel body ----------------------------------
def _mlp_kernel(x_ref, w1_ref, b1_ref, w2_ref, b2_ref, w3_ref, b3_ref, out_ref):
    # x_ref : (tile_b, 256) bf16   w1/w2 : (256, 256) bf16   w3 : (256, 128) bf16
    # biases: (1, 256)/(1, 128) f32.  All three dots are single-pass bf16 MXU
    # matmuls with f32 accumulation; activations never leave VMEM/vregs.
    x = x_ref[...]
    h = jnp.dot(x, w1_ref[...], preferred_element_type=jnp.float32) + b1_ref[...]
    h = jnp.maximum(h, 0.0).astype(jnp.bfloat16)                    # ReLU (VPU)
    h = jnp.dot(h, w2_ref[...], preferred_element_type=jnp.float32) + b2_ref[...]
    h = jnp.maximum(h, 0.0).astype(jnp.bfloat16)                    # ReLU (VPU)
    out_ref[...] = (jnp.dot(h, w3_ref[...], preferred_element_type=jnp.float32)
                    + b3_ref[...])                                  # lane-dense f32 store


# ----------------------- one-time weight re-layout -------------------------
def prepare_params(params):
    """Transpose, pad and cast the PyTorch-layout weights ONCE.

    nn.Linear stores weight as (out_features, in_features); the kernel consumes
    (in, out) so the batch stays on the MXU M axis.  fc3 is zero-padded from 6
    to 128 output lanes so the kernel's final store is full-width and unmasked.
    """
    w1 = params["fc1_w"].T.astype(jnp.bfloat16)
    w2 = params["fc2_w"].T.astype(jnp.bfloat16)
    w3p = (jnp.zeros((HIDDEN, OUT_PAD), jnp.bfloat16)
           .at[:, :OUT].set(params["fc3_w"].T.astype(jnp.bfloat16)))
    b1 = params["fc1_b"].reshape(1, -1).astype(jnp.float32)
    b2 = params["fc2_b"].reshape(1, -1).astype(jnp.float32)
    b3p = (jnp.zeros((1, OUT_PAD), jnp.float32)
           .at[:, :OUT].set(params["fc3_b"].astype(jnp.float32)))
    return {"w1": w1, "b1": b1, "w2": w2, "b2": b2, "w3p": w3p, "b3p": b3p}


def _choose_tiling(B):
    """Pick (tile_b, B_pad): big tiles, sublane-aligned, >=2 grid steps when large."""
    b8 = _round_up(max(B, 8), 8)
    if b8 <= 512:
        # Launch/weight-DMA dominated regime: one tile, one grid step.
        return b8, b8
    # Large batch: big tiles (amortize ~0.35us/step) but keep >= 2 grid steps so
    # the "parallel" axis can be split across v7x's two TensorCores.
    tile_b = min(MAX_TILE_B, _round_up(-(-b8 // 2), 8))
    b_pad = _round_up(b8, tile_b)
    return tile_b, b_pad


# ------------------------------ forward -----------------------------------
@functools.partial(jax.jit, static_argnames=())
def disentangle_forward(x, prepared):
    """Forward pass of DisentangleModel: relu(fc1) -> relu(fc2) -> fc3.

    `prepared` must come from prepare_params() (already transposed/padded/cast).
    """
    B, D = x.shape
    assert D == HIDDEN, f"expected last dim {HIDDEN}, got {D}"
    x = x.astype(jnp.bfloat16)

    tile_b, B_pad = _choose_tiling(B)
    if B_pad != B:
        x = jnp.pad(x, ((0, B_pad - B), (0, 0)))
    grid = (B_pad // tile_b,)

    w1, b1 = prepared["w1"], prepared["b1"]
    w2, b2 = prepared["w2"], prepared["b2"]
    w3p, b3p = prepared["w3p"], prepared["b3p"]

    def full2d(a):
        return pl.BlockSpec(a.shape, lambda i: (0, 0))

    # Advisory cost: real fc3 width (6), weights/biases counted once.
    flops = 2 * B_pad * HIDDEN * (HIDDEN + HIDDEN + OUT)
    bytes_accessed = (
        2 * B_pad * HIDDEN                       # x (bf16)
        + 2 * (2 * HIDDEN * HIDDEN)              # w1, w2 (bf16, fetched once)
        + 2 * HIDDEN * OUT_PAD                   # w3 padded (bf16, fetched once)
        + 4 * (2 * HIDDEN + OUT_PAD)             # biases (f32, fetched once)
        + 4 * B_pad * OUT_PAD                    # out (f32)
    )

    out = pl.pallas_call(
        _mlp_kernel,
        out_shape=jax.ShapeDtypeStruct((B_pad, OUT_PAD), jnp.float32),
        grid=grid,
        in_specs=[
            pl.BlockSpec((tile_b, HIDDEN), lambda i: (i, 0)),   # x: tiled over batch
            full2d(w1), full2d(b1),
            full2d(w2), full2d(b2),
            full2d(w3p), full2d(b3p),
        ],
        out_specs=pl.BlockSpec((tile_b, OUT_PAD), lambda i: (i, 0)),
        compiler_params=pltpu.CompilerParams(
            dimension_semantics=("parallel",)),
        cost_estimate=pl.CostEstimate(flops=flops, transcendentals=0,
                                      bytes_accessed=bytes_accessed),
    )(x, w1, b1, w2, b2, w3p, b3p)

    return out[:B, :OUT]


# ---------------- pure-JAX f32 reference (validation only) ----------------
def reference(x, p):
    x = x.astype(jnp.float32)
    h = jnp.maximum(x @ p["fc1_w"].T + p["fc1_b"], 0.0)
    h = jnp.maximum(h @ p["fc2_w"].T + p["fc2_b"], 0.0)
    return h @ p["fc3_w"].T + p["fc3_b"]


if __name__ == "__main__":
    # Small shapes consistent with the module: feature dim fixed at 256 -> 6.
    B = 8
    key = jax.random.PRNGKey(0)
    ks = jax.random.split(key, 7)
    params = {
        "fc1_w": jax.random.normal(ks[0], (HIDDEN, HIDDEN), jnp.float32) * 0.05,
        "fc1_b": jax.random.normal(ks[1], (HIDDEN,), jnp.float32) * 0.05,
        "fc2_w": jax.random.normal(ks[2], (HIDDEN, HIDDEN), jnp.float32) * 0.05,
        "fc2_b": jax.random.normal(ks[3], (HIDDEN,), jnp.float32) * 0.05,
        "fc3_w": jax.random.normal(ks[4], (OUT, HIDDEN), jnp.float32) * 0.05,
        "fc3_b": jax.random.normal(ks[5], (OUT,), jnp.float32) * 0.05,
    }
    x = jax.random.normal(ks[6], (B, HIDDEN), jnp.float32)

    prepared = prepare_params(params)           # one-time weight re-layout
    out = jax.block_until_ready(disentangle_forward(x, prepared))
    ref = jax.block_until_ready(reference(x, params))

    assert out.shape == (B, OUT), out.shape
    # bf16 operands / f32 accumulation: allow ~1e-2-scale relative error.
    scale = max(1.0, float(jnp.max(jnp.abs(ref))))
    err = float(jnp.max(jnp.abs(out - ref)))
    if err > 2e-2 * scale:
        raise AssertionError(f"kernel/reference mismatch: max abs err {err}")
    print("KERNEL_OK")
</pallas_src>

<mosaic_0001>
module attributes {stable_mosaic.version = 11 : i64} {
  func.func @_mlp_kernel(%arg0: i32, %arg1: memref<8x256xbf16, #tpu.memory_space<vmem>>, %arg2: memref<256x256xbf16, #tpu.memory_space<vmem>>, %arg3: memref<1x256xf32, #tpu.memory_space<vmem>>, %arg4: memref<256x256xbf16, #tpu.memory_space<vmem>>, %arg5: memref<1x256xf32, #tpu.memory_space<vmem>>, %arg6: memref<256x128xbf16, #tpu.memory_space<vmem>>, %arg7: memref<1x128xf32, #tpu.memory_space<vmem>>, %arg8: memref<8x128xf32, #tpu.memory_space<vmem>>) attributes {dimension_semantics = [#tpu.dimension_semantics<parallel>], iteration_bounds = array<i64: 1>, scalar_prefetch = 0 : i64, scratch_operands = 0 : i64, tpu.core_type = #tpu.core_type<tc>, window_params = [{transform_indices = @transform_0, window_bounds = array<i64: 8, 256>}, {pipeline_mode = #tpu.pipeline_mode<synchronous>, transform_indices = @transform_1, window_bounds = array<i64: 256, 256>}, {pipeline_mode = #tpu.pipeline_mode<synchronous>, transform_indices = @transform_2, window_bounds = array<i64: 1, 256>}, {pipeline_mode = #tpu.pipeline_mode<synchronous>, transform_indices = @transform_3, window_bounds = array<i64: 256, 256>}, {pipeline_mode = #tpu.pipeline_mode<synchronous>, transform_indices = @transform_4, window_bounds = array<i64: 1, 256>}, {pipeline_mode = #tpu.pipeline_mode<synchronous>, transform_indices = @transform_5, window_bounds = array<i64: 256, 128>}, {pipeline_mode = #tpu.pipeline_mode<synchronous>, transform_indices = @transform_6, window_bounds = array<i64: 1, 128>}, {transform_indices = @transform_7, window_bounds = array<i64: 8, 128>}]} {
    %c0 = arith.constant 0 : index
    %c0_0 = arith.constant 0 : index
    %0 = vector.load %arg1[%c0, %c0_0] : memref<8x256xbf16, #tpu.memory_space<vmem>>, vector<8x256xbf16>
    %c0_1 = arith.constant 0 : index
    %c0_2 = arith.constant 0 : index
    %1 = vector.load %arg2[%c0_1, %c0_2] : memref<256x256xbf16, #tpu.memory_space<vmem>>, vector<256x256xbf16>
    %cst = arith.constant dense<0.000000e+00> : vector<8x256xf32>
    %2 = tpu.matmul %0, %1, %cst {dimension_numbers = #tpu.dot_dimension_numbers<[1], [0], [0], [1], [0, 0, 1, 1], [], []>} : vector<8x256xbf16>, vector<256x256xbf16>, vector<8x256xf32> -> vector<8x256xf32>
    %c0_3 = arith.constant 0 : index
    %c0_4 = arith.constant 0 : index
    %3 = vector.load %arg3[%c0_3, %c0_4] : memref<1x256xf32, #tpu.memory_space<vmem>>, vector<1x256xf32>
    %4 = vector.broadcast %3 : vector<1x256xf32> to vector<8x256xf32>
    %5 = arith.addf %2, %4 : vector<8x256xf32>
    %cst_5 = arith.constant 0.000000e+00 : f32
    %6 = vector.broadcast %cst_5 : f32 to vector<8x256xf32>
    %7 = arith.maximumf %5, %6 : vector<8x256xf32>
    %8 = arith.truncf %7 : vector<8x256xf32> to vector<8x256xbf16>
    %c0_6 = arith.constant 0 : index
    %c0_7 = arith.constant 0 : index
    %9 = vector.load %arg4[%c0_6, %c0_7] : memref<256x256xbf16, #tpu.memory_space<vmem>>, vector<256x256xbf16>
    %cst_8 = arith.constant dense<0.000000e+00> : vector<8x256xf32>
    %10 = tpu.matmul %8, %9, %cst_8 {dimension_numbers = #tpu.dot_dimension_numbers<[1], [0], [0], [1], [0, 0, 1, 1], [], []>} : vector<8x256xbf16>, vector<256x256xbf16>, vector<8x256xf32> -> vector<8x256xf32>
    %c0_9 = arith.constant 0 : index
    %c0_10 = arith.constant 0 : index
    %11 = vector.load %arg5[%c0_9, %c0_10] : memref<1x256xf32, #tpu.memory_space<vmem>>, vector<1x256xf32>
    %12 = vector.broadcast %11 : vector<1x256xf32> to vector<8x256xf32>
    %13 = arith.addf %10, %12 : vector<8x256xf32>
    %cst_11 = arith.constant 0.000000e+00 : f32
    %14 = vector.broadcast %cst_11 : f32 to vector<8x256xf32>
    %15 = arith.maximumf %13, %14 : vector<8x256xf32>
    %16 = arith.truncf %15 : vector<8x256xf32> to vector<8x256xbf16>
    %c0_12 = arith.constant 0 : index
    %c0_13 = arith.constant 0 : index
    %17 = vector.load %arg6[%c0_12, %c0_13] : memref<256x128xbf16, #tpu.memory_space<vmem>>, vector<256x128xbf16>
    %cst_14 = arith.constant dense<0.000000e+00> : vector<8x128xf32>
    %18 = tpu.matmul %16, %17, %cst_14 {dimension_numbers = #tpu.dot_dimension_numbers<[1], [0], [0], [1], [0, 0, 1, 1], [], []>} : vector<8x256xbf16>, vector<256x128xbf16>, vector<8x128xf32> -> vector<8x128xf32>
    %c0_15 = arith.constant 0 : index
    %c0_16 = arith.constant 0 : index
    %19 = vector.load %arg7[%c0_15, %c0_16] : memref<1x128xf32, #tpu.memory_space<vmem>>, vector<1x128xf32>
    %20 = vector.broadcast %19 : vector<1x128xf32> to vector<8x128xf32>
    %21 = arith.addf %18, %20 : vector<8x128xf32>
    %c0_17 = arith.constant 0 : index
    %c0_18 = arith.constant 0 : index
    %22 = vector.load %arg8[%c0_17, %c0_18] : memref<8x128xf32, #tpu.memory_space<vmem>>, vector<8x128xf32>
    tpu.vector_store %arg8[%c0_17, %c0_18], %21 {strides = array<i32>} : memref<8x128xf32, #tpu.memory_space<vmem>>, vector<8x128xf32>,
    return
  }
  func.func @transform_0(%arg0: i32) -> (i32, i32) {
    %c0_i32 = arith.constant 0 : i32
    %c0_i32_0 = arith.constant 0 : i32
    return %arg0, %c0_i32 : i32, i32
  }
  func.func @transform_1(%arg0: i32) -> (i32, i32) {
    %c0_i32 = arith.constant 0 : i32
    %c0_i32_0 = arith.constant 0 : i32
    %c0_i32_1 = arith.constant 0 : i32
    return %c0_i32, %c0_i32_0 : i32, i32
  }
  func.func @transform_2(%arg0: i32) -> (i32, i32) {
    %c0_i32 = arith.constant 0 : i32
    %c0_i32_0 = arith.constant 0 : i32
    %c0_i32_1 = arith.constant 0 : i32
    return %c0_i32, %c0_i32_0 : i32, i32
  }
  func.func @transform_3(%arg0: i32) -> (i32, i32) {
    %c0_i32 = arith.constant 0 : i32
    %c0_i32_0 = arith.constant 0 : i32
    %c0_i32_1 = arith.constant 0 : i32
    return %c0_i32, %c0_i32_0 : i32, i32
  }
  func.func @transform_4(%arg0: i32) -> (i32, i32) {
    %c0_i32 = arith.constant 0 : i32
    %c0_i32_0 = arith.constant 0 : i32
    %c0_i32_1 = arith.constant 0 : i32
    return %c0_i32, %c0_i32_0 : i32, i32
  }
  func.func @transform_5(%arg0: i32) -> (i32, i32) {
    %c0_i32 = arith.constant 0 : i32
    %c0_i32_0 = arith.constant 0 : i32
    %c0_i32_1 = arith.constant 0 : i32
    return %c0_i32, %c0_i32_0 : i32, i32
  }
  func.func @transform_6(%arg0: i32) -> (i32, i32) {
    %c0_i32 = arith.constant 0 : i32
    %c0_i32_0 = arith.constant 0 : i32
    %c0_i32_1 = arith.constant 0 : i32
    return %c0_i32, %c0_i32_0 : i32, i32
  }
  func.func @transform_7(%arg0: i32) -> (i32, i32) {
    %c0_i32 = arith.constant 0 : i32
    %c0_i32_0 = arith.constant 0 : i32
    return %arg0, %c0_i32 : i32, i32
  }
}

</mosaic_0001>

<bundles_post_ra>
// kernel: disentangle_forward.1
= control target key start
LH: loop header
LB: loop body
LE: loop exit
PB: predicated region body
PF: predicated region fallthrough
CT: control target
= control target key end

     0   :  { %12 = vsyncpa [#allocation3], 0  ;;  %s1209_s0 = inlined_call_operand.vmem [shape: bf16[8,256], index: 0, kind: input, shape index: {}]   ;;  %s1210_s1 = inlined_call_operand.hbm [shape: bf16[256,256], index: 1, kind: input, shape index: {}]   ;;  %s1211_s2 = inlined_call_operand.vmem [shape: f32[1,256], index: 2, kind: input, shape index: {}]   ;;  %s1212_s3 = inlined_call_operand.hbm [shape: bf16[256,256], index: 3, kind: input, shape index: {}]   ;;  %s1213_s4 = inlined_call_operand.vmem [shape: f32[1,256], index: 4, kind: input, shape index: {}]   ;;  %s1214_s5 = inlined_call_operand.hbm [shape: bf16[256,128], index: 5, kind: input, shape index: {}]   ;;  %s1215_s6 = inlined_call_operand.vmem [shape: f32[1,128], index: 6, kind: input, shape index: {}]   ;;  %s1216_s7 = inlined_call_operand.hbm [shape: f32[8,128], index: 7, kind: output, shape index: {}]  }
   0x1   :  { %13 = vsyncpa [#allocation6], 0 }
   0x2   :  { %14 = vsyncpa [#allocation4], 0  ;;  %s1088_s24 = smov [#allocation5]   ;;  %s1089_s26 = smov [#allocation2]  }
   0x3   :  { %s36_s25 = sshll.u32 %s1088_s24, 4  ;;  %s22_s27 = sshll.u32 %s1089_s26, 4  ;;  %s37_s25 = int_to_ptr.vmem [resolvable:$true] %s36_s25  ;;  %s1136_s27 = int_to_ptr.vmem [resolvable:$true] %s22_s27 }
   0x4   :  { %s994_s30 = scalar_lea.hbm %s1212_s3, 4096 }
   0x5   :  { %p995_p0 = scmp.ne.s32.totalorder %s1212_s3, %s994_s30  ;;  %p998_p1 = scmp.lt.u32.totalorder %s994_s30, %s1212_s3 }
   0x7   :  { %p1000_p2 = pnand %p998_p1, %p995_p0 }
   0x9   :  { %1003 = shalt.err (!%p1000_p2)
}
   0xa   :  { %s1004_s12 = scalar_lea.vmem %s37_s25, 4096  ;;  %p1009_p4 = scmp.lt.s32.totalorder %s37_s25, %s37_s25 }
   0xb   :  { %p1005_p3 = scmp.ne.s32.totalorder %s37_s25, %s1004_s12  ;;  %p1010_p5 = scmp.lt.s32.totalorder %s1004_s12, %s1004_s12 }
   0xd   :  { %p1011_p6 = por %p1010_p5, %p1009_p4 }
   0xf   :  { %p1012_p7 = pnand %p1011_p6, %p1005_p3 }
  0x11   :  { %1015 = shalt.err (!%p1012_p7)
}
  0x12   :  { %s1090_s13 = smov 128   ;;  %s1091_s14 = smov 8  }
  0x13   :  { %42 = dma.hbm_to_vmem [thread:$0]  %s1212_s3, 4096, %s37_s25, [#allocation6], %s1090_s13, %s1090_s13, %s1091_s14  }
  0x14   :  { %s1016_s19 = scalar_lea.hbm %s1210_s1, 4096 }
  0x15   :  { %p1017_p8 = scmp.ne.s32.totalorder %s1210_s1, %s1016_s19  ;;  %p1020_p9 = scmp.lt.u32.totalorder %s1016_s19, %s1210_s1 }
  0x17   :  { %p1022_p10 = pnand %p1020_p9, %p1017_p8 }
  0x19   :  { %1025 = shalt.err (!%p1022_p10)
}
  0x1a   :  { %s1026_s24 = scalar_lea.vmem %s1136_s27, 4096  ;;  %p1031_p12 = scmp.lt.s32.totalorder %s1136_s27, %s1136_s27 }
  0x1b   :  { %p1027_p11 = scmp.ne.s32.totalorder %s1136_s27, %s1026_s24  ;;  %p1032_p13 = scmp.lt.s32.totalorder %s1026_s24, %s1026_s24 }
  0x1d   :  { %p1033_p0 = por %p1032_p13, %p1031_p12 }
  0x1f   :  { %p1034_p1 = pnand %p1033_p0, %p1027_p11 }
  0x21   :  { %1037 = shalt.err (!%p1034_p1)
}
  0x22   :  { %28 = dma.hbm_to_vmem [thread:$0]  %s1210_s1, 4096, %s1136_s27, [#allocation3], %s1090_s13, %s1090_s13, %s1091_s14  }
  0x23   :  { %s1092_s26 = smov [#allocation7]   ;;  %s1038_s8 = scalar_lea.hbm %s1214_s5, 2048 }
  0x24   :  { %s50_s28 = sshll.u32 %s1092_s26, 4  ;;  %p1039_p2 = scmp.ne.s32.totalorder %s1214_s5, %s1038_s8  ;;  %s51_s28 = int_to_ptr.vmem [resolvable:$true] %s50_s28 }
  0x25   :  { %p1042_p3 = scmp.lt.u32.totalorder %s1038_s8, %s1214_s5 }
  0x27   :  { %p1044_p4 = pnand %p1042_p3, %p1039_p2 }
  0x29   :  { %1047 = shalt.err (!%p1044_p4)
}
  0x2a   :  { %s1048_s15 = scalar_lea.vmem %s51_s28, 2048  ;;  %p1053_p6 = scmp.lt.s32.totalorder %s51_s28, %s51_s28 }
  0x2b   :  { %p1049_p5 = scmp.ne.s32.totalorder %s51_s28, %s1048_s15  ;;  %p1054_p7 = scmp.lt.s32.totalorder %s1048_s15, %s1048_s15 }
  0x2d   :  { %p1055_p8 = por %p1054_p7, %p1053_p6 }
  0x2f   :  { %p1056_p9 = pnand %p1055_p8, %p1049_p5 }
  0x31   :  { %1059 = shalt.err (!%p1056_p9)
}
  0x32   :  { %s1093_s1 = smov 64   ;;  %s1094_s27 = smov 4  }
  0x33   :  { %56 = dma.hbm_to_vmem [thread:$0]  %s1214_s5, 2048, %s51_s28, [#allocation6], %s1093_s1, %s1093_s1, %s1094_s27  }
  0x34   :  { %1082 = dma.done.wait [#allocation3], 4096  }
  0x35   :  { %1083 = vsyncadd [#allocation3], 4294963200 }
  0x36   :  { %1084 = dma.done.wait [#allocation6], 6144  }
  0x37   :  { %1085 = vsyncadd [#allocation6], 4294961152  ;;  %v880_v0 = vld [vmem:[#allocation2 + $0x4] ss:$8 sps:$4 sm:$0xff]   ;;  %v882_v1 = vld [vmem:[#allocation2] ss:$8 sps:$4 sm:$0xff]  }
  0x38   :  { %281 = vmatprep.subr.bf16.mxu0 %v880_v0  ;;  %v883_v2 = vld [vmem:[#allocation2 + $0x14] ss:$8 sps:$4 sm:$0xff]   ;;  %v885_v3 = vld [vmem:[#allocation2 + $0x10] ss:$8 sps:$4 sm:$0xff]   ;;  %v886_v4 = vld [vmem:[#allocation2 + $0x24] ss:$8 sps:$4 sm:$0xff]  }
  0x39   :  { %282 = vmatpush1.bf16.msra.mxu0 %v882_v1  ;;  %v888_v5 = vld [vmem:[#allocation2 + $0x20] ss:$8 sps:$4 sm:$0xff]   ;;  %v889_v6 = vld [vmem:[#allocation2 + $0x34] ss:$8 sps:$4 sm:$0xff]   ;;  %v891_v7 = vld [vmem:[#allocation2 + $0x30] ss:$8 sps:$4 sm:$0xff]  }
  0x3a   :  { %283 = vmatprep.subr.bf16.mxu0 %v883_v2  ;;  %v892_v8 = vld [vmem:[#allocation2 + $0x44] ss:$8 sps:$4 sm:$0xff]   ;;  %v894_v9 = vld [vmem:[#allocation2 + $0x40] ss:$8 sps:$4 sm:$0xff]   ;;  %v895_v10 = vld [vmem:[#allocation2 + $0x54] ss:$8 sps:$4 sm:$0xff]  }
  0x3b   :  { %v897_v11 = vld [vmem:[#allocation2 + $0x50] ss:$8 sps:$4 sm:$0xff]   ;;  %v898_v12 = vld [vmem:[#allocation2 + $0x64] ss:$8 sps:$4 sm:$0xff]   ;;  %v900_v13 = vld [vmem:[#allocation2 + $0x60] ss:$8 sps:$4 sm:$0xff]  }
  0x3c   :  { %v1182_v14 = vld [vmem:[%s1209_s0] sm:$0xff]  ;;  %v930_v16 = vld [vmem:[#allocation5 + $0x4] ss:$8 sps:$4 sm:$0xff]   ;;  %v932_v17 = vld [vmem:[#allocation5] ss:$8 sps:$4 sm:$0xff]  }
  0x3d   :  { %284 = vmatpush1.bf16.msra.mxu0 %v885_v3  ;;  %v768_v15 = vcombine.high %v1182_v14, %v1182_v14  ;;  %v933_v18 = vld [vmem:[#allocation5 + $0x14] ss:$8 sps:$4 sm:$0xff]   ;;  %530 = vmatprep.subr.bf16.mxu1 %v930_v16  ;;  %v903_v20 = vld [vmem:[#allocation2 + $0x70] ss:$8 sps:$4 sm:$0xff]   ;;  %v936_v22 = vld [vmem:[#allocation5 + $0x24] ss:$8 sps:$4 sm:$0xff]   ;;  %v767_v55 = vcombine.low %v1182_v14, %v1182_v14 }
  0x3e   :  { %285 = vmatprep.subr.bf16.mxu0 %v886_v4  ;;  %v901_v19 = vld [vmem:[#allocation2 + $0x74] ss:$8 sps:$4 sm:$0xff]   ;;  %531 = vmatpush1.bf16.msra.mxu1 %v932_v17  ;;  %v935_v21 = vld [vmem:[#allocation5 + $0x10] ss:$8 sps:$4 sm:$0xff]   ;;  %v904_v23 = vld [vmem:[#allocation2 + $0x84] ss:$8 sps:$4 sm:$0xff]  }
  0x3f   :  { %313 = vmatprep.mubr.bf16.mxu0 %v768_v15  ;;  %532 = vmatprep.subr.bf16.mxu1 %v933_v18  ;;  %v906_v24 = vld [vmem:[#allocation2 + $0x80] ss:$8 sps:$4 sm:$0xff]   ;;  %v939_v26 = vld [vmem:[#allocation5 + $0x34] ss:$8 sps:$4 sm:$0xff]   ;;  %v909_v28 = vld [vmem:[#allocation2 + $0x90] ss:$8 sps:$4 sm:$0xff]   ;;  %v104_v15 = vlaneseq }
  0x40   :  { %v938_v25 = vld [vmem:[#allocation5 + $0x20] ss:$8 sps:$4 sm:$0xff]   ;;  %v907_v27 = vld [vmem:[#allocation2 + $0x94] ss:$8 sps:$4 sm:$0xff]   ;;  %v941_v29 = vld [vmem:[#allocation5 + $0x30] ss:$8 sps:$4 sm:$0xff]  }
  0x41   :  { %286 = vmatpush1.bf16.msra.mxu0 %v888_v5  ;;  %v942_v30 = vld [vmem:[#allocation5 + $0x44] ss:$8 sps:$4 sm:$0xff]   ;;  %v912_v32 = vld [vmem:[#allocation2 + $0xa0] ss:$8 sps:$4 sm:$0xff]   ;;  %v945_v34 = vld [vmem:[#allocation5 + $0x54] ss:$8 sps:$4 sm:$0xff]  }
  0x42   :  { %287 = vmatprep.subr.bf16.mxu0 %v889_v6  ;;  %533 = vmatpush1.bf16.msra.mxu1 %v935_v21  ;;  %v910_v31 = vld [vmem:[#allocation2 + $0xa4] ss:$8 sps:$4 sm:$0xff]   ;;  %v944_v33 = vld [vmem:[#allocation5 + $0x40] ss:$8 sps:$4 sm:$0xff]   ;;  %v913_v35 = vld [vmem:[#allocation2 + $0xb4] ss:$8 sps:$4 sm:$0xff]  }
  0x43   :  { %534 = vmatprep.subr.bf16.mxu1 %v936_v22  ;;  %v947_v36 = vld [vmem:[#allocation5 + $0x50] ss:$8 sps:$4 sm:$0xff]   ;;  %v948_v38 = vld [vmem:[#allocation5 + $0x64] ss:$8 sps:$4 sm:$0xff]   ;;  %v950_v40 = vld [vmem:[#allocation5 + $0x60] ss:$8 sps:$4 sm:$0xff]  }
  0x44   :  { %v915_v37 = vld [vmem:[#allocation2 + $0xb0] ss:$8 sps:$4 sm:$0xff]   ;;  %v916_v39 = vld [vmem:[#allocation2 + $0xc4] ss:$8 sps:$4 sm:$0xff]   ;;  %v918_v41 = vld [vmem:[#allocation2 + $0xc0] ss:$8 sps:$4 sm:$0xff]  }
  0x45   :  { %288 = vmatpush1.bf16.msra.mxu0 %v891_v7  ;;  %v951_v42 = vld [vmem:[#allocation5 + $0x74] ss:$8 sps:$4 sm:$0xff]   ;;  %v953_v44 = vld [vmem:[#allocation5 + $0x70] ss:$8 sps:$4 sm:$0xff]   ;;  %v954_v46 = vld [vmem:[#allocation5 + $0x84] ss:$8 sps:$4 sm:$0xff]  }
  0x46   :  { %289 = vmatprep.subr.bf16.mxu0 %v892_v8  ;;  %535 = vmatpush1.bf16.msra.mxu1 %v938_v25  ;;  %v919_v43 = vld [vmem:[#allocation2 + $0xd4] ss:$8 sps:$4 sm:$0xff]   ;;  %v921_v45 = vld [vmem:[#allocation2 + $0xd0] ss:$8 sps:$4 sm:$0xff]   ;;  %v922_v47 = vld [vmem:[#allocation2 + $0xe4] ss:$8 sps:$4 sm:$0xff]  }
  0x47   :  { %536 = vmatprep.subr.bf16.mxu1 %v939_v26  ;;  %v956_v48 = vld [vmem:[#allocation5 + $0x80] ss:$8 sps:$4 sm:$0xff]   ;;  %v957_v50 = vld [vmem:[#allocation5 + $0x94] ss:$8 sps:$4 sm:$0xff]   ;;  %v959_v52 = vld [vmem:[#allocation5 + $0x90] ss:$8 sps:$4 sm:$0xff]  }
  0x48   :  { %v924_v49 = vld [vmem:[#allocation2 + $0xe0] ss:$8 sps:$4 sm:$0xff]   ;;  %v925_v51 = vld [vmem:[#allocation2 + $0xf4] ss:$8 sps:$4 sm:$0xff]   ;;  %v927_v53 = vld [vmem:[#allocation2 + $0xf0] ss:$8 sps:$4 sm:$0xff]  }
  0x49   :  { %290 = vmatpush1.bf16.msra.mxu0 %v894_v9  ;;  %v960_v54 = vld [vmem:[#allocation5 + $0xa4] ss:$8 sps:$4 sm:$0xff]   ;;  %v962_v56 = vld [vmem:[#allocation5 + $0xa0] ss:$8 sps:$4 sm:$0xff]   ;;  %v963_v57 = vld [vmem:[#allocation5 + $0xb4] ss:$8 sps:$4 sm:$0xff]  }
  0x4a   :  { %291 = vmatprep.subr.bf16.mxu0 %v895_v10  ;;  %537 = vmatpush1.bf16.msra.mxu1 %v941_v29  ;;  %v965_v58 = vld [vmem:[#allocation5 + $0xb0] ss:$8 sps:$4 sm:$0xff]   ;;  %v966_v59 = vld [vmem:[#allocation5 + $0xc4] ss:$8 sps:$4 sm:$0xff]   ;;  %v968_v60 = vld [vmem:[#allocation5 + $0xc0] ss:$8 sps:$4 sm:$0xff]  }
  0x4b   :  { %538 = vmatprep.subr.bf16.mxu1 %v942_v30  ;;  %v969_v61 = vld [vmem:[#allocation5 + $0xd4] ss:$8 sps:$4 sm:$0xff]   ;;  %v971_v62 = vld [vmem:[#allocation5 + $0xd0] ss:$8 sps:$4 sm:$0xff]   ;;  %v972_v63 = vld [vmem:[#allocation5 + $0xe4] ss:$8 sps:$4 sm:$0xff]  }
  0x4c   :  { %v974_v0 = vld [vmem:[#allocation5 + $0xe0] ss:$8 sps:$4 sm:$0xff]   ;;  %v975_v1 = vld [vmem:[#allocation5 + $0xf4] ss:$8 sps:$4 sm:$0xff]   ;;  %v977_v2 = vld [vmem:[#allocation5 + $0xf0] ss:$8 sps:$4 sm:$0xff]  }
  0x4d   :  { %292 = vmatpush1.bf16.msra.mxu0 %v897_v11  ;;  %v978_v3 = vld [vmem:[#allocation7 + $0x40] sm:$0xff]   ;;  %v980_v5 = vld [vmem:[#allocation7 + $0x48] sm:$0xff]   ;;  %v982_v7 = vld [vmem:[#allocation7 + $0x50] sm:$0xff]   ;;  %v105_v16 = vshrl.u32 %v104_v15, 7 }
  0x4e   :  { %293 = vmatprep.subr.bf16.mxu0 %v898_v12  ;;  %539 = vmatpush1.bf16.msra.mxu1 %v944_v33  ;;  %v979_v4 = vld [vmem:[#allocation7] sm:$0xff]   ;;  %v981_v6 = vld [vmem:[#allocation7 + $0x8] sm:$0xff]   ;;  %v983_v8 = vld [vmem:[#allocation7 + $0x10] sm:$0xff]  }
  0x4f   :  { %540 = vmatprep.subr.bf16.mxu1 %v945_v34  ;;  %v984_v9 = vld [vmem:[#allocation7 + $0x58] sm:$0xff]   ;;  %v986_v11 = vld [vmem:[#allocation7 + $0x60] sm:$0xff]   ;;  %v989_v14 = vld [vmem:[#allocation7 + $0x28] sm:$0xff]   ;;  %v106_v17 = vsub.s32 0, %v105_v16 }
  0x50   :  { %v985_v10 = vld [vmem:[#allocation7 + $0x18] sm:$0xff]   ;;  %v987_v12 = vld [vmem:[#allocation7 + $0x20] sm:$0xff]   ;;  %v991_v33 = vld [vmem:[#allocation7 + $0x30] sm:$0xff]  }
  0x51   :  { %294 = vmatpush1.bf16.msra.mxu0 %v900_v13  ;;  %v988_v13 = vld [vmem:[#allocation7 + $0x68] sm:$0xff]   ;;  %v102_v18 = vld [vmem:[%s1211_s2] sm:$0x3] }
  0x52   :  { %295 = vmatprep.subr.bf16.mxu0 %v901_v19  ;;  %541 = vmatpush1.bf16.msra.mxu1 %v947_v36  ;;  %v110_v19 = vsub.s32 1, %v105_v16  ;;  %v992_v34 = vld [vmem:[#allocation7 + $0x78] sm:$0xff]  }
  0x53   :  { %542 = vmatprep.subr.bf16.mxu1 %v948_v38  ;;  %v358_v36 = vld [vmem:[%s1213_s4] sm:$0x3]  ;;  %s1095_s4 = smov [#allocation8]  }
  0x54   :  { %v111_v21 = vrot.slane %v102_v18, %v110_v19  ;;  %v367_v38 = vrot.slane %v358_v36, %v110_v19  ;;  %s757_s21 = sshll.u32 %s1095_s4, 4  ;;  %s758_s21 = int_to_ptr.vmem [resolvable:$true] %s757_s21 }
  0x55   :  { %296 = vmatpush1.bf16.msra.mxu0 %v903_v20  ;;  %v107_v20 = vrot.slane %v102_v18, %v106_v17  ;;  %s1060_s22 = scalar_lea.vmem %s758_s21, 128  ;;  %p1065_p11 = scmp.lt.s32.totalorder %s758_s21, %s758_s21 }
  0x56   :  { %297 = vmatprep.subr.bf16.mxu0 %v904_v23  ;;  %543 = vmatpush1.bf16.msra.mxu1 %v950_v40  ;;  %p1061_p10 = scmp.ne.s32.totalorder %s758_s21, %s1060_s22  ;;  %p1066_p12 = scmp.lt.s32.totalorder %s1060_s22, %s1060_s22 }
  0x57   :  { %544 = vmatprep.subr.bf16.mxu1 %v951_v42 }
  0x58   :  { %p1067_p13 = por %p1066_p12, %p1065_p11 }
  0x59   :  { %298 = vmatpush1.bf16.msra.mxu0 %v906_v24 }
  0x5a   :  { %299 = vmatprep.subr.bf16.mxu0 %v907_v27  ;;  %545 = vmatpush1.bf16.msra.mxu1 %v953_v44  ;;  %p1068_p0 = pnand %p1067_p13, %p1061_p10 }
  0x5b   :  { %546 = vmatprep.subr.bf16.mxu1 %v954_v46 }
  0x5d   :  { %300 = vmatpush1.bf16.msra.mxu0 %v909_v28 }
  0x5e   :  { %301 = vmatprep.subr.bf16.mxu0 %v910_v31  ;;  %547 = vmatpush1.bf16.msra.mxu1 %v956_v48 }
  0x5f   :  { %548 = vmatprep.subr.bf16.mxu1 %v957_v50  ;;  %v833_v50 = vld [vmem:[%s1215_s6] ss:$0 sm:$0xff] }
  0x61   :  { %302 = vmatpush1.bf16.msra.mxu0 %v912_v32  ;;  %v990_v32 = vld [vmem:[#allocation7 + $0x70] sm:$0xff]  }
  0x62   :  { %303 = vmatprep.subr.bf16.mxu0 %v913_v35  ;;  %549 = vmatpush1.bf16.msra.mxu1 %v959_v52  ;;  %v993_v35 = vld [vmem:[#allocation7 + $0x38] sm:$0xff]  }
  0x63   :  { %550 = vmatprep.subr.bf16.mxu1 %v960_v54 }
  0x65   :  { %304 = vmatpush1.bf16.msra.mxu0 %v915_v37  ;;  %v363_v37 = vrot.slane %v358_v36, %v106_v17 }
  0x66   :  { %305 = vmatprep.subr.bf16.mxu0 %v916_v39  ;;  %551 = vmatpush1.bf16.msra.mxu1 %v962_v56 }
  0x67   :  { %552 = vmatprep.subr.bf16.mxu1 %v963_v57 }
  0x69   :  { %306 = vmatpush1.bf16.msra.mxu0 %v918_v41 }
  0x6a   :  { %307 = vmatprep.subr.bf16.mxu0 %v919_v43  ;;  %553 = vmatpush1.bf16.msra.mxu1 %v965_v58 }
  0x6b   :  { %554 = vmatprep.subr.bf16.mxu1 %v966_v59 }
  0x6d   :  { %308 = vmatpush1.bf16.msra.mxu0 %v921_v45 }
  0x6e   :  { %309 = vmatprep.subr.bf16.mxu0 %v922_v47  ;;  %555 = vmatpush1.bf16.msra.mxu1 %v968_v60 }
  0x6f   :  { %556 = vmatprep.subr.bf16.mxu1 %v969_v61 }
  0x71   :  { %310 = vmatpush1.bf16.msra.mxu0 %v924_v49 }
  0x72   :  { %311 = vmatprep.subr.bf16.mxu0 %v925_v51  ;;  %557 = vmatpush1.bf16.msra.mxu1 %v971_v62 }
  0x73   :  { %558 = vmatprep.subr.bf16.mxu1 %v972_v63 }
  0x75   :  { %312 = vmatpush1.bf16.msra.mxu0 %v927_v53 }
  0x76   :  { %559 = vmatpush1.bf16.msra.mxu1 %v974_v0  ;;  %850 = vmatprep.subr.bf16.mxu0 %v978_v3 }
  0x77   :  { %560 = vmatprep.subr.bf16.mxu1 %v975_v1 }
  0x78   :  { %314 = vmatmul.mubr.bf16.vlgmr.msra.gmra.mrb[0].mxu0 %v767_v55 }
  0x79   :  { %851 = vmatpush3.bf16.msra.mxu0 %v979_v4 }
  0x7a   :  { %561 = vmatpush1.bf16.msra.mxu1 %v977_v2  ;;  %852 = vmatprep.subr.bf16.mxu0 %v980_v5 }
  0x7d   :  { %853 = vmatpush3.bf16.msra.mxu0 %v981_v6 }
  0x7e   :  { %854 = vmatprep.subr.bf16.mxu0 %v982_v7 }
  0x81   :  { %855 = vmatpush3.bf16.msra.mxu0 %v983_v8 }
  0x82   :  { %856 = vmatprep.subr.bf16.mxu0 %v984_v9 }
  0x85   :  { %857 = vmatpush3.bf16.msra.mxu0 %v985_v10 }
  0x86   :  { %858 = vmatprep.subr.bf16.mxu0 %v986_v11 }
  0x89   :  { %859 = vmatpush3.bf16.msra.mxu0 %v987_v12 }
  0x8a   :  { %860 = vmatprep.subr.bf16.mxu0 %v988_v13 }
  0x8d   :  { %861 = vmatpush3.bf16.msra.mxu0 %v989_v14 }
  0x8e   :  { %862 = vmatprep.subr.bf16.mxu0 %v990_v32 }
  0x91   :  { %863 = vmatpush3.bf16.msra.mxu0 %v991_v33 }
  0x92   :  { %864 = vmatprep.subr.bf16.mxu0 %v992_v34 }
  0x95   :  { %865 = vmatpush3.bf16.msra.mxu0 %v993_v35 }
 0x14b   :  { %v315_v22 = vpop.f32.mrb[0].mxu0 }
 0x14c   :  { %v316_v23 = vadd.f32 %v315_v22, %v107_v20  ;;  %v317_v24 = vpop.f32.mrb[1].mxu0 }
 0x14d   :  { %v318_v25 = vadd.f32 %v317_v24, %v111_v21  ;;  %v319_v26 = vpop.f32.mrb[2].mxu0 }
 0x14e   :  { %v322_v27 = vmax.f32 %v316_v23, 0.0  ;;  %v320_v28 = vpop.f32.mrb[3].mxu0 }
 0x14f   :  { %v323_v29 = vmax.f32 %v318_v25, 0.0 }
 0x150   :  { %v324_v31 = vpack.c.bf16 %v322_v27, %v322_v27 }
 0x151   :  { %v325_v30 = vpack.c.bf16 %v323_v29, %v323_v29 }
 0x153   :  { %562 = vmatprep.mubr.bf16.mxu1 %v325_v30 }
 0x154   :  { %563 = vmatmul.mubr.bf16.vlgmr.msra.gmra.mrb[0].mxu1 %v324_v31 }
 0x227   :  { %v564_v39 = vpop.f32.mrb[0].mxu1 }
 0x228   :  { %v565_v40 = vadd.f32 %v564_v39, %v363_v37  ;;  %v566_v41 = vpop.f32.mrb[1].mxu1 }
 0x229   :  { %v567_v42 = vadd.f32 %v566_v41, %v367_v38  ;;  %v568_v43 = vpop.f32.mrb[2].mxu1 }
 0x22a   :  { %v571_v44 = vmax.f32 %v565_v40, 0.0  ;;  %v569_v45 = vpop.f32.mrb[3].mxu1 }
 0x22b   :  { %v572_v46 = vmax.f32 %v567_v42, 0.0 }
 0x22c   :  { %v573_v48 = vpack.c.bf16 %v571_v44, %v571_v44 }
 0x22d   :  { %v574_v47 = vpack.c.bf16 %v572_v46, %v572_v46 }
 0x22f   :  { %742 = vmatprep.mubr.bf16.mxu0 %v574_v47 }
 0x230   :  { %743 = vmatmul.mubr.bf16.vlgmr.msra.gmra.mrb[4].mxu0 %v573_v48 }
 0x303   :  { %v866_v49 = vpop.f32.mrb[4].mxu0 }
 0x304   :  { %v867_v51 = vpop.f32.mrb[5].mxu0 }
 0x305   :  { %v868_v52 = vadd.f32 %v867_v51, %v866_v49  ;;  %v869_v53 = vpop.f32.mrb[6].mxu0 }
 0x306   :  { %v870_v54 = vpop.f32.mrb[7].mxu0 }
 0x307   :  { %v745_v55 = vadd.f32 %v868_v52, %v833_v50 }
 0x309   :  { %750 = vst [vmem:[#allocation8] sm:$0xff] %v745_v55 }
 0x30a   :  { %1071 = shalt.err (!%p1068_p0)
}
 0x30b   :  { %s1072_s6 = scalar_lea.hbm %s1216_s7, 128 }
 0x30c   :  { %p1073_p1 = scmp.ne.s32.totalorder %s1216_s7, %s1072_s6  ;;  %p1076_p2 = scmp.lt.u32.totalorder %s1072_s6, %s1216_s7 }
 0x30e   :  { %p1078_p3 = pnand %p1076_p2, %p1073_p1 }
 0x310   :  { %1081 = shalt.err (!%p1078_p3)
}
 0x311   :  { %760 = dma.vmem_to_hbm [thread:$0]  %s758_s21, 128, %s1216_s7, [#allocation4]  }
 0x312   :  { %1086 = dma.done.wait [#allocation4], 128  }
 0x313   :  { %1087 = vsyncadd [#allocation4], 4294967168 }
 0x314   :  { %764 = vsyncpa [#allocation3], 1 }
 0x315   :  { %765 = vsyncpa [#allocation6], 1 }
 0x316   :  { %766 = vsyncpa [#allocation4], 1 }

</bundles_post_ra>
